<compile_context>
chip_gen: v6e
topology: v6e:2x2x1
jax: 0.10.0
libtpu: 0.0.40
codegen_flags: <defaults>
</compile_context>

<pallas_src>
import functools

import jax
import jax.numpy as jnp
from jax.experimental import pallas as pl
from jax.experimental.pallas import tpu as pltpu


def _round_up(x, m):
    return (x + m - 1) // m * m


def _cdiv(a, b):
    return (a + b - 1) // b


def _masked_loss_partial_kernel(pred_ref, true_ref, msq_ref, mabs_ref,
                                sq_out_ref, abs_out_ref,
                                acc_sq_ref, acc_abs_ref):
    # pred_ref / true_ref: (8, lane_blk) native dtype (cast to f32 in-kernel)
    # msq_ref / mabs_ref:  (8, lane_blk) f32  (precomputed mask reductions)
    # sq_out_ref/abs_out_ref: (1, 8, 128) f32 per-partition partial sums
    # acc_*_ref: (8, lane_blk) f32 per-lane accumulators (VMEM scratch)
    j = pl.program_id(1)

    @pl.when(j == 0)
    def _init():
        acc_sq_ref[...] = jnp.zeros_like(acc_sq_ref)
        acc_abs_ref[...] = jnp.zeros_like(acc_abs_ref)

    p = pred_ref[...].astype(jnp.float32)
    t = true_ref[...].astype(jnp.float32)
    diff = p - t

    acc_sq_ref[...] += diff * diff * msq_ref[...]
    acc_abs_ref[...] += jnp.abs(diff) * mabs_ref[...]

    @pl.when(j == pl.num_programs(1) - 1)
    def _finalize():
        sq_out_ref[...] = jnp.broadcast_to(
            jnp.sum(acc_sq_ref[...]), (1, 8, 128)).astype(sq_out_ref.dtype)
        abs_out_ref[...] = jnp.broadcast_to(
            jnp.sum(acc_abs_ref[...]), (1, 8, 128)).astype(abs_out_ref.dtype)


@functools.partial(jax.jit, static_argnames="pred_len")
def custom_masked_loss(pred, true, mask, pred_len):
    """Equivalent of CustomMaskedLoss(pred_len).forward(pred, true, mask)."""
    B = pred.shape[0]
    P = int(pred_len)
    M = mask.shape[-1]
    N = B * P
    n_valid = N * M  # MSE/L1 mean is over the broadcast (B, P, M) shape

    # --- slice + mask reduction on native layout (single pass over mask) ---
    pred_flat = pred[:, -P:, -1].reshape(N)                      # (N,) native dtype
    true_flat = true[:, -P:, -1].reshape(N)                      # (N,)
    m = mask[:, -P:, :].astype(jnp.float32)                      # (B, P, M)
    msq_flat = jnp.sum(m * m, axis=-1).reshape(N)                # (N,) f32
    mabs_flat = jnp.sum(jnp.abs(m), axis=-1).reshape(N)          # (N,) f32

    # --- sublane-dense tiling: (8, C) slabs, ~2 MiB f32 per block per array ---
    SUBLANES = 8
    LANE_TARGET = 65536                      # 8*65536*4B = 2 MiB per f32 block
    cols_needed = _cdiv(N, SUBLANES)
    lane_blk = min(LANE_TARGET, _round_up(max(cols_needed, 1), 128))
    total_blocks = _cdiv(cols_needed, lane_blk)
    # Split across v7x's 2 TensorCores only when each core gets >= 4 blocks.
    n_parts = 2 if total_blocks >= 8 else 1
    blocks_per_part = _cdiv(total_blocks, n_parts)
    C = lane_blk * blocks_per_part * n_parts
    n_pad = SUBLANES * C
    pad = n_pad - N

    def to_slab(x):
        # Pad folds into the single layout copy made by the slice/reshape above;
        # zero msq/mabs columns contribute exactly zero to both sums.
        if pad:
            x = jnp.pad(x, (0, pad))
        return x.reshape(SUBLANES, C)

    pred_s = to_slab(pred_flat)
    true_s = to_slab(true_flat)
    msq_s = to_slab(msq_flat)
    mabs_s = to_slab(mabs_flat)

    grid = (n_parts, blocks_per_part)

    def col_map(c, j):
        return (0, c * blocks_per_part + j)

    cost = pl.CostEstimate(
        flops=int(7 * n_pad + 4 * N * M),
        transcendentals=0,
        bytes_accessed=int(pred_s.nbytes + true_s.nbytes + msq_s.nbytes
                           + mabs_s.nbytes + 2 * n_parts * 8 * 128 * 4),
    )

    part_sq, part_abs = pl.pallas_call(
        _masked_loss_partial_kernel,
        out_shape=(
            jax.ShapeDtypeStruct((n_parts, 8, 128), jnp.float32),
            jax.ShapeDtypeStruct((n_parts, 8, 128), jnp.float32),
        ),
        grid_spec=pltpu.PrefetchScalarGridSpec(
            num_scalar_prefetch=0,
            grid=grid,
            in_specs=[
                pl.BlockSpec((SUBLANES, lane_blk), col_map),
                pl.BlockSpec((SUBLANES, lane_blk), col_map),
                pl.BlockSpec((SUBLANES, lane_blk), col_map),
                pl.BlockSpec((SUBLANES, lane_blk), col_map),
            ],
            out_specs=[
                pl.BlockSpec((1, 8, 128), lambda c, j: (c, 0, 0)),
                pl.BlockSpec((1, 8, 128), lambda c, j: (c, 0, 0)),
            ],
            scratch_shapes=[
                pltpu.VMEM((SUBLANES, lane_blk), jnp.float32),
                pltpu.VMEM((SUBLANES, lane_blk), jnp.float32),
            ],
        ),
        compiler_params=pltpu.CompilerParams(
            dimension_semantics=("parallel", "arbitrary"),
            vmem_limit_bytes=32 * 1024 * 1024,
        ),
        cost_estimate=cost,
    )(pred_s, true_s, msq_s, mabs_s)

    # Combine per-core partials; sqrt only after all partial sums are summed.
    inv_n = 1.0 / float(n_valid)
    mse = jnp.sum(part_sq[:, 0, 0]) * inv_n
    mae = jnp.sum(part_abs[:, 0, 0]) * inv_n
    return jnp.sqrt(mse) + mae


def _reference_loss(pred, true, mask, pred_len):
    # Pure-JAX reference of the PyTorch forward, for a correctness check.
    m = mask[:, -pred_len:, :]
    p = pred[:, -pred_len:, -1:] * m
    t = true[:, -pred_len:, -1:] * m
    return jnp.sqrt(jnp.mean((p - t) ** 2)) + jnp.mean(jnp.abs(p - t))


if __name__ == "__main__":
    key = jax.random.PRNGKey(0)
    k1, k2, k3 = jax.random.split(key, 3)

    B, T, D = 2, 16, 4          # batch, sequence length, features
    pred_len = 8                # CustomMaskedLoss(pred_len=8)

    pred = jax.random.normal(k1, (B, T, D), dtype=jnp.float32)
    true = jax.random.normal(k2, (B, T, D), dtype=jnp.float32)
    mask = (jax.random.uniform(k3, (B, T, D)) > 0.3).astype(jnp.float32)

    loss = custom_masked_loss(pred, true, mask, pred_len)
    loss = jax.block_until_ready(loss)

    ref = _reference_loss(pred, true, mask, pred_len)
    assert jnp.allclose(loss, ref, rtol=1e-5, atol=1e-5), (loss, ref)

    print("KERNEL_OK")
</pallas_src>

<mosaic_0001>
module attributes {stable_mosaic.version = 11 : i64} {
  func.func @_masked_loss_partial_kernel(%arg0: i32, %arg1: i32, %arg2: memref<8x128xf32, #tpu.memory_space<vmem>>, %arg3: memref<8x128xf32, #tpu.memory_space<vmem>>, %arg4: memref<8x128xf32, #tpu.memory_space<vmem>>, %arg5: memref<8x128xf32, #tpu.memory_space<vmem>>, %arg6: memref<1x8x128xf32, #tpu.memory_space<vmem>>, %arg7: memref<1x8x128xf32, #tpu.memory_space<vmem>>, %arg8: memref<8x128xf32, #tpu.memory_space<vmem>>, %arg9: memref<8x128xf32, #tpu.memory_space<vmem>>) attributes {dimension_semantics = [#tpu.dimension_semantics<parallel>, #tpu.dimension_semantics<arbitrary>], iteration_bounds = array<i64: 1, 1>, scalar_prefetch = 0 : i64, scratch_operands = 2 : i64, tpu.core_type = #tpu.core_type<tc>, window_params = [{transform_indices = @transform_0, window_bounds = array<i64: 8, 128>}, {transform_indices = @transform_1, window_bounds = array<i64: 8, 128>}, {transform_indices = @transform_2, window_bounds = array<i64: 8, 128>}, {transform_indices = @transform_3, window_bounds = array<i64: 8, 128>}, {transform_indices = @transform_4, window_bounds = array<i64: 1, 8, 128>}, {transform_indices = @transform_5, window_bounds = array<i64: 1, 8, 128>}]} {
    %c0_i32 = arith.constant 0 : i32
    %0 = arith.cmpi eq, %arg1, %c0_i32 : i32
    %1 = arith.extui %0 : i1 to i32
    %c0_i32_0 = arith.constant 0 : i32
    %2 = arith.cmpi ne, %1, %c0_i32_0 : i32
    scf.if %2 {
      %cst = arith.constant 0.000000e+00 : f32
      %21 = vector.broadcast %cst : f32 to vector<8x128xf32>
      %c0_18 = arith.constant 0 : index
      %c0_19 = arith.constant 0 : index
      %22 = vector.load %arg8[%c0_18, %c0_19] : memref<8x128xf32, #tpu.memory_space<vmem>>, vector<8x128xf32>
      tpu.vector_store %arg8[%c0_18, %c0_19], %21 {strides = array<i32>} : memref<8x128xf32, #tpu.memory_space<vmem>>, vector<8x128xf32>,
      %cst_20 = arith.constant 0.000000e+00 : f32
      %23 = vector.broadcast %cst_20 : f32 to vector<8x128xf32>
      %c0_21 = arith.constant 0 : index
      %c0_22 = arith.constant 0 : index
      %24 = vector.load %arg9[%c0_21, %c0_22] : memref<8x128xf32, #tpu.memory_space<vmem>>, vector<8x128xf32>
      tpu.vector_store %arg9[%c0_21, %c0_22], %23 {strides = array<i32>} : memref<8x128xf32, #tpu.memory_space<vmem>>, vector<8x128xf32>,
    } else {
    }
    %c0 = arith.constant 0 : index
    %c0_1 = arith.constant 0 : index
    %3 = vector.load %arg2[%c0, %c0_1] : memref<8x128xf32, #tpu.memory_space<vmem>>, vector<8x128xf32>
    %c0_2 = arith.constant 0 : index
    %c0_3 = arith.constant 0 : index
    %4 = vector.load %arg3[%c0_2, %c0_3] : memref<8x128xf32, #tpu.memory_space<vmem>>, vector<8x128xf32>
    %5 = arith.subf %3, %4 : vector<8x128xf32>
    %c0_4 = arith.constant 0 : index
    %c0_5 = arith.constant 0 : index
    %6 = vector.load %arg8[%c0_4, %c0_5] : memref<8x128xf32, #tpu.memory_space<vmem>>, vector<8x128xf32>
    %7 = arith.mulf %5, %5 : vector<8x128xf32>
    %c0_6 = arith.constant 0 : index
    %c0_7 = arith.constant 0 : index
    %8 = vector.load %arg4[%c0_6, %c0_7] : memref<8x128xf32, #tpu.memory_space<vmem>>, vector<8x128xf32>
    %9 = arith.mulf %7, %8 : vector<8x128xf32>
    %10 = arith.addf %6, %9 : vector<8x128xf32>
    %c0_8 = arith.constant 0 : index
    %c0_9 = arith.constant 0 : index
    %11 = vector.load %arg8[%c0_8, %c0_9] : memref<8x128xf32, #tpu.memory_space<vmem>>, vector<8x128xf32>
    tpu.vector_store %arg8[%c0_8, %c0_9], %10 {strides = array<i32>} : memref<8x128xf32, #tpu.memory_space<vmem>>, vector<8x128xf32>,
    %c0_10 = arith.constant 0 : index
    %c0_11 = arith.constant 0 : index
    %12 = vector.load %arg9[%c0_10, %c0_11] : memref<8x128xf32, #tpu.memory_space<vmem>>, vector<8x128xf32>
    %13 = math.absf %5 : vector<8x128xf32>
    %c0_12 = arith.constant 0 : index
    %c0_13 = arith.constant 0 : index
    %14 = vector.load %arg5[%c0_12, %c0_13] : memref<8x128xf32, #tpu.memory_space<vmem>>, vector<8x128xf32>
    %15 = arith.mulf %13, %14 : vector<8x128xf32>
    %16 = arith.addf %12, %15 : vector<8x128xf32>
    %c0_14 = arith.constant 0 : index
    %c0_15 = arith.constant 0 : index
    %17 = vector.load %arg9[%c0_14, %c0_15] : memref<8x128xf32, #tpu.memory_space<vmem>>, vector<8x128xf32>
    tpu.vector_store %arg9[%c0_14, %c0_15], %16 {strides = array<i32>} : memref<8x128xf32, #tpu.memory_space<vmem>>, vector<8x128xf32>,
    %c0_i32_16 = arith.constant 0 : i32
    %18 = arith.cmpi eq, %arg1, %c0_i32_16 : i32
    %19 = arith.extui %18 : i1 to i32
    %c0_i32_17 = arith.constant 0 : i32
    %20 = arith.cmpi ne, %19, %c0_i32_17 : i32
    scf.if %20 {
      %c0_18 = arith.constant 0 : index
      %c0_19 = arith.constant 0 : index
      %21 = vector.load %arg8[%c0_18, %c0_19] : memref<8x128xf32, #tpu.memory_space<vmem>>, vector<8x128xf32>
      %22 = vector.shape_cast %21 : vector<8x128xf32> to vector<1x8x128xf32>
      %cst = arith.constant dense<0.000000e+00> : vector<1xf32>
      %23 = vector.multi_reduction <add>, %22, %cst [1, 2] : vector<1x8x128xf32> to vector<1xf32>
      %24 = vector.shape_cast %23 : vector<1xf32> to vector<1x1x1xf32>
      %25 = vector.extract %24[0, 0, 0] : f32 from vector<1x1x1xf32>
      %26 = vector.broadcast %25 : f32 to vector<1x8x128xf32>
      %c0_20 = arith.constant 0 : index
      %c0_21 = arith.constant 0 : index
      %c0_22 = arith.constant 0 : index
      %27 = vector.load %arg6[%c0_20, %c0_21, %c0_22] : memref<1x8x128xf32, #tpu.memory_space<vmem>>, vector<1x8x128xf32>
      tpu.vector_store %arg6[%c0_20, %c0_21, %c0_22], %26 {strides = array<i32>} : memref<1x8x128xf32, #tpu.memory_space<vmem>>, vector<1x8x128xf32>,
      %c0_23 = arith.constant 0 : index
      %c0_24 = arith.constant 0 : index
      %28 = vector.load %arg9[%c0_23, %c0_24] : memref<8x128xf32, #tpu.memory_space<vmem>>, vector<8x128xf32>
      %29 = vector.shape_cast %28 : vector<8x128xf32> to vector<1x8x128xf32>
      %cst_25 = arith.constant dense<0.000000e+00> : vector<1xf32>
      %30 = vector.multi_reduction <add>, %29, %cst_25 [1, 2] : vector<1x8x128xf32> to vector<1xf32>
      %31 = vector.shape_cast %30 : vector<1xf32> to vector<1x1x1xf32>
      %32 = vector.extract %31[0, 0, 0] : f32 from vector<1x1x1xf32>
      %33 = vector.broadcast %32 : f32 to vector<1x8x128xf32>
      %c0_26 = arith.constant 0 : index
      %c0_27 = arith.constant 0 : index
      %c0_28 = arith.constant 0 : index
      %34 = vector.load %arg7[%c0_26, %c0_27, %c0_28] : memref<1x8x128xf32, #tpu.memory_space<vmem>>, vector<1x8x128xf32>
      tpu.vector_store %arg7[%c0_26, %c0_27, %c0_28], %33 {strides = array<i32>} : memref<1x8x128xf32, #tpu.memory_space<vmem>>, vector<1x8x128xf32>,
    } else {
    }
    return
  }
  func.func @transform_0(%arg0: i32, %arg1: i32) -> (i32, i32) {
    %c1_i32 = arith.constant 1 : i32
    %0 = arith.muli %arg0, %c1_i32 : i32
    %1 = arith.addi %0, %arg1 : i32
    %c0_i32 = arith.constant 0 : i32
    %c0_i32_0 = arith.constant 0 : i32
    return %c0_i32, %1 : i32, i32
  }
  func.func @transform_1(%arg0: i32, %arg1: i32) -> (i32, i32) {
    %c1_i32 = arith.constant 1 : i32
    %0 = arith.muli %arg0, %c1_i32 : i32
    %1 = arith.addi %0, %arg1 : i32
    %c0_i32 = arith.constant 0 : i32
    %c0_i32_0 = arith.constant 0 : i32
    return %c0_i32, %1 : i32, i32
  }
  func.func @transform_2(%arg0: i32, %arg1: i32) -> (i32, i32) {
    %c1_i32 = arith.constant 1 : i32
    %0 = arith.muli %arg0, %c1_i32 : i32
    %1 = arith.addi %0, %arg1 : i32
    %c0_i32 = arith.constant 0 : i32
    %c0_i32_0 = arith.constant 0 : i32
    return %c0_i32, %1 : i32, i32
  }
  func.func @transform_3(%arg0: i32, %arg1: i32) -> (i32, i32) {
    %c1_i32 = arith.constant 1 : i32
    %0 = arith.muli %arg0, %c1_i32 : i32
    %1 = arith.addi %0, %arg1 : i32
    %c0_i32 = arith.constant 0 : i32
    %c0_i32_0 = arith.constant 0 : i32
    return %c0_i32, %1 : i32, i32
  }
  func.func @transform_4(%arg0: i32, %arg1: i32) -> (i32, i32, i32) {
    %c0_i32 = arith.constant 0 : i32
    %c0_i32_0 = arith.constant 0 : i32
    %c0_i32_1 = arith.constant 0 : i32
    return %arg0, %c0_i32, %c0_i32_0 : i32, i32, i32
  }
  func.func @transform_5(%arg0: i32, %arg1: i32) -> (i32, i32, i32) {
    %c0_i32 = arith.constant 0 : i32
    %c0_i32_0 = arith.constant 0 : i32
    %c0_i32_1 = arith.constant 0 : i32
    return %arg0, %c0_i32, %c0_i32_0 : i32, i32, i32
  }
}

</mosaic_0001>

<bundles_post_ra>
// kernel: squeeze.5
= control target key start
LH: loop header
LB: loop body
LE: loop exit
PB: predicated region body
PF: predicated region fallthrough
CT: control target
= control target key end

     0   :  { %vm8_vm0 = vcmask 64512   ;;  %vm14_vm1 = vcmask 130112   ;;  %s42_s0 = inlined_call_operand.vmem [shape: f32[2,8], index: 0, kind: input, shape index: {}]   ;;  %s43_s1 = inlined_call_operand.vmem [shape: f32[16], index: 1, kind: output, shape index: {}]  }
   0x1   :  { %v5_v0 = vld [vmem:[%s42_s0] sm:$0x3]  ;;  %s25_s0 = smov 8  }
   0x2   :  { %6 = vst [vmem:[#allocation1] sm:$0x3] %v5_v0 }
   0x9   :  { %v11_v1 = vld [vmem:[#allocation1 + $0x1] sm:$0x1]   ;;  %v7_v2 = vld [vmem:[#allocation1] sm:$0x1]  }
   0xa   :  { %12 = vrot.lane.b32.xlu0 %v11_v1, %s25_s0  ;;  %9 = vst.msk [vmem:[#allocation0] sm:$0x1] %vm8_vm0, %v7_v2  }
  0x7c   :  { %v13_v3 = vpop.permute.xlu0 %12  }
  0x7d   :  { %15 = vst.msk [vmem:[#allocation0] sm:$0x1] %vm14_vm1, %v13_v3  }
  0x84   :  { %v20_v4 = vld [vmem:[#allocation0] sm:$0x1] }
  0x85   :  { %23 = vst [vmem:[%s43_s1] sm:$0x1] %v20_v4 }

// kernel: custom_masked_loss.1
= control target key start
LH: loop header
LB: loop body
LE: loop exit
PB: predicated region body
PF: predicated region fallthrough
CT: control target
= control target key end

     0   :  { %s219_s0 = inlined_call_operand.vmem [shape: f32[8,128], index: 0, kind: input, shape index: {}]   ;;  %s220_s1 = inlined_call_operand.vmem [shape: f32[8,128], index: 1, kind: input, shape index: {}]   ;;  %s221_s2 = inlined_call_operand.vmem [shape: f32[8,128], index: 2, kind: input, shape index: {}]   ;;  %s222_s3 = inlined_call_operand.vmem [shape: f32[8,128], index: 3, kind: input, shape index: {}]   ;;  %s223_s4 = inlined_call_operand.vmem [shape: f32[1,8,128], index: 4, kind: output, shape index: {0}]   ;;  %s224_s5 = inlined_call_operand.vmem [shape: f32[1,8,128], index: 5, kind: output, shape index: {1}]  }
   0x1   :  { %v93_v0 = vld [vmem:[%s219_s0] sm:$0xff] }
   0x2   :  { %v94_v1 = vld [vmem:[%s220_s1] sm:$0xff] }
   0x3   :  { %v95_v2 = vsub.f32 %v93_v0, %v94_v1  ;;  %v98_v3 = vld [vmem:[%s221_s2] sm:$0xff] }
   0x4   :  { %v104_v6 = vld [vmem:[%s222_s3] sm:$0xff] }
   0x5   :  { %v97_v4 = vmul.f32 %v95_v2, %v95_v2  ;;  %v103_v5 = vand.u32 2147483647, %v95_v2 }
   0x7   :  { %v99_v7 = vmul.f32 %v98_v3, %v97_v4  ;;  %v105_v8 = vmul.f32 %v104_v6, %v103_v5 }
   0x9   :  { %112 = vadd.xlane.f32.xlu0 %v99_v7 }
   0xd   :  { %124 = vadd.xlane.f32.xlu0 %v105_v8 }
  0x92   :  { %v113_v9 = vpop.xlane.xlu0 %112 }
  0x93   :  { %v114_v10 = vrot.slane %v113_v9, 4 }
  0x95   :  { %v115_v11 = vadd.f32 %v114_v10, %v113_v9 }
  0x96   :  { %v125_v12 = vpop.xlane.xlu0 %124 }
  0x97   :  { %v116_v13 = vrot.slane %v115_v11, 2  ;;  %v126_v14 = vrot.slane %v125_v12, 4 }
  0x99   :  { %v127_v15 = vadd.f32 %v126_v14, %v125_v12  ;;  %v117_v16 = vadd.f32 %v116_v13, %v115_v11 }
  0x9b   :  { %v128_v17 = vrot.slane %v127_v15, 2  ;;  %v118_v18 = vrot.slane %v117_v16, 1 }
  0x9d   :  { %v129_v19 = vadd.f32 %v128_v17, %v127_v15  ;;  %v119_v20 = vadd.f32 %v118_v18, %v117_v16 }
  0x9f   :  { %167 = vpush %v119_v20  ;;  %v130_v21 = vrot.slane %v129_v19, 1 }
  0xa1   :  { %v131_v22 = vadd.f32 %v130_v21, %v129_v19 }
  0xa3   :  { %169 = vpush %v131_v22 }
  0xd0   :  { %s168_s0 = spop %167 }
  0xd1   :  { %v121_v23 = vstv %s168_s0 }
  0xd2   :  { %122 = vst [vmem:[%s223_s4] sm:$0xff] %v121_v23 }
  0xd4   :  { %s170_s3 = spop %169 }
  0xd5   :  { %v133_v24 = vstv %s170_s3 }
  0xd6   :  { %134 = vst [vmem:[%s224_s5] sm:$0xff] %v133_v24 }

</bundles_post_ra>
